<compile_context>
chip_gen: v6e
topology: v6e:2x2x1
jax: 0.10.0
libtpu: 0.0.40
codegen_flags: <defaults>
</compile_context>

<pallas_src>
import jax
import jax.numpy as jnp
from jax import lax
from jax.experimental import pallas as pl
from jax.experimental.pallas import tpu as pltpu


# ---------------------------------------------------------------------------
# small helpers
# ---------------------------------------------------------------------------
def _round_up(x, m):
    return (x + m - 1) // m * m


def _softplus(x):
    return jnp.maximum(x, 0.0) + jnp.log1p(jnp.exp(-jnp.abs(x)))


def _log_g(x):
    # log_g(x) = where(x >= 0, log(relu(x) + 0.5), -softplus(-x))
    return jnp.where(x >= 0.0, jnp.log(jnp.maximum(x, 0.0) + 0.5), -_softplus(-x))


def _g_linear(x):
    # g(x) = exp(log_g(x)) = where(x >= 0, x + 0.5, sigmoid(x)); stable sigmoid.
    e = jnp.exp(-jnp.abs(x))
    return jnp.where(x >= 0.0, x + 0.5, e / (1.0 + e))


def _shift_down(x, shift, fill):
    # y[i] = x[i - shift] for i >= shift, `fill` otherwise (along axis 0).
    pad = jnp.full((shift,) + x.shape[1:], fill, dtype=x.dtype)
    return jnp.concatenate([pad, x[: x.shape[0] - shift]], axis=0)


# ---------------------------------------------------------------------------
# Pallas kernel: one (batch block, T chunk) per grid step.
#   grid = (B_blocks, T_chunks); T axis is sequential ("arbitrary") and carries
#   the linear-space hidden state across chunks in VMEM scratch.
# ---------------------------------------------------------------------------
def _mingru_kernel(x_ref, h0_ref, w_ref, b_ref, out_ref, carry_ref, proj_ref):
    Bb, Tc, Ip = x_ref.shape
    Hp = h0_ref.shape[2]
    t_idx = pl.program_id(1)

    @pl.when(t_idx == 0)
    def _init():
        # carry = g(h0) in linear space.
        carry_ref[...] = _g_linear(h0_ref[...])                    # (Bb, 1, Hp)

    # ---- fused projection: one bf16 MXU matmul per chunk (x cast in-kernel) --
    x2d = x_ref[...].reshape(Bb * Tc, Ip).astype(w_ref.dtype)
    proj = jnp.dot(x2d, w_ref[...], preferred_element_type=jnp.float32) + b_ref[...]
    proj_ref[...] = proj.reshape(Bb, Tc, 2 * Hp)                   # stage in VMEM

    # ---- per-batch-row gating + exact-f32 parallel scan (bounded live ranges)
    def scan_batch_row(b, carry):
        p = proj_ref[b]                                            # (Tc, 2Hp) f32
        k = p[:, :Hp]
        hl = p[:, Hp:]

        # Gates in linear space: z = sigmoid(k), a = sigmoid(-k) = 1 - z.
        ek = jnp.exp(-jnp.abs(k))
        rk = 1.0 / (1.0 + ek)
        z = jnp.where(k >= 0.0, rk, ek * rk)
        a = jnp.where(k >= 0.0, ek * rk, rk)
        bv = z * _g_linear(hl)                                     # input term

        # Hillis-Steele scan of h_t = a_t * h_{t-1} + b_t along time (axis 0).
        # Element t ends up holding (A, B) with h_t = A * h_chunk_start + B.
        # Combine: (A_l, B_l) o (A_r, B_r) = (A_l*A_r, A_r*B_l + B_r).
        A, Bv = a, bv
        shift = 1
        while shift < Tc:                                          # ceil(log2(Tc)) stages
            A_sh = _shift_down(A, shift, 1.0)                      # identity coeff below
            B_sh = _shift_down(Bv, shift, 0.0)
            Bv = A * B_sh + Bv
            A = A_sh * A
            shift *= 2

        h = A * carry_ref[b] + Bv                                  # (Tc, Hp)
        out_ref[b] = h.astype(out_ref.dtype)
        carry_ref[b] = h[Tc - 1:Tc, :]                             # carry to next chunk
        return carry

    lax.fori_loop(0, Bb, scan_batch_row, 0)


# ---------------------------------------------------------------------------
# Wrapper
# ---------------------------------------------------------------------------
def mingru_forward(x, h0, wz, bz, wh, bh, *, t_chunk=128, b_block=4,
                   proj_dtype=jnp.bfloat16, out_dtype=None):
    """x: (B, T, I); h0: (B, H); wz/wh: (I, H) (= W^T of nn.Linear); bz/bh: (H,)."""
    B, T, I = x.shape
    H = wz.shape[1]
    out_dtype = x.dtype if out_dtype is None else out_dtype

    # Lane-pad hidden and input dims to multiples of 128 (unmasked stores,
    # full-width MXU contraction).  Padding is skipped when already aligned.
    Hp = _round_up(H, 128)
    Ip = _round_up(I, 128)

    # Batch blocking: keep >= 2 batch blocks whenever B >= 2 (keeps both v7x
    # TensorCores busy via the "parallel" batch grid axis).
    Bb = max(1, min(b_block, B))
    if B >= 2:
        Bb = min(Bb, pl.cdiv(B, 2))
    Bp = _round_up(B, Bb)

    # T chunk: multiple of 16 sublanes.
    Tc = _round_up(max(16, min(t_chunk, T)), 16)
    Tp = _round_up(T, Tc)

    # Only pad when needed; NO wrapper-side dtype cast of x (done in-kernel).
    if (Bp, Tp, Ip) != (B, T, I):
        x = jnp.pad(x, ((0, Bp - B), (0, Tp - T), (0, Ip - I)))
    if (Bp, Hp) != (B, H):
        h0 = jnp.pad(h0, ((0, Bp - B), (0, Hp - H)))
    h0 = h0.reshape(Bp, 1, Hp).astype(jnp.float32)

    # Fuse the two projections into one weight / bias (bf16 weight, f32 bias).
    w_f = jnp.concatenate(
        [jnp.pad(wz, ((0, Ip - I), (0, Hp - H))),
         jnp.pad(wh, ((0, Ip - I), (0, Hp - H)))], axis=1).astype(proj_dtype)  # (Ip, 2Hp)
    b_f = jnp.concatenate(
        [jnp.pad(bz, (0, Hp - H)),
         jnp.pad(bh, (0, Hp - H))]).reshape(1, 2 * Hp).astype(jnp.float32)      # (1, 2Hp)

    # Generation-aware VMEM budget (v7x: 64 MiB/TC, v5e/v6e: 128 MiB).
    try:
        vmem_cap = int(pltpu.get_tpu_info().vmem_capacity_bytes)
    except Exception:
        vmem_cap = 64 * 1024 * 1024
    vmem_limit = int(max(32 * 1024 * 1024,
                         min(0.75 * vmem_cap, 100 * 1024 * 1024)))

    grid = (Bp // Bb, Tp // Tc)

    out = pl.pallas_call(
        _mingru_kernel,
        out_shape=jax.ShapeDtypeStruct((Bp, Tp, Hp), out_dtype),
        grid_spec=pltpu.PrefetchScalarGridSpec(
            num_scalar_prefetch=0,
            grid=grid,
            in_specs=[
                pl.BlockSpec((Bb, Tc, Ip), lambda bi, ti: (bi, ti, 0)),   # x
                pl.BlockSpec((Bb, 1, Hp), lambda bi, ti: (bi, 0, 0)),     # h0
                pl.BlockSpec((Ip, 2 * Hp), lambda bi, ti: (0, 0)),        # fused W (bf16)
                pl.BlockSpec((1, 2 * Hp), lambda bi, ti: (0, 0)),         # fused bias
            ],
            out_specs=pl.BlockSpec((Bb, Tc, Hp), lambda bi, ti: (bi, ti, 0)),
            scratch_shapes=[
                pltpu.VMEM((Bb, 1, Hp), jnp.float32),        # carried hidden state
                pltpu.VMEM((Bb, Tc, 2 * Hp), jnp.float32),   # staged projection
            ],
        ),
        compiler_params=pltpu.CompilerParams(
            dimension_semantics=("parallel", "arbitrary"),
            vmem_limit_bytes=vmem_limit,
        ),
    )(x, h0, w_f, b_f)

    return out[:B, :T, :H]


# ---------------------------------------------------------------------------
# Pure-JAX reference (mirrors the PyTorch module; exact log-space scan).
# `proj_dtype` lets the reference use the same bf16 projection inputs as the
# kernel so the comparison isolates the scan math.
# ---------------------------------------------------------------------------
def mingru_ref(x, h0, wz, bz, wh, bh, proj_dtype=None):
    if proj_dtype is not None:
        xc, wzc, whc = x.astype(proj_dtype), wz.astype(proj_dtype), wh.astype(proj_dtype)
    else:
        xc, wzc, whc = x, wz, wh
    k = jnp.einsum("bti,ih->bth", xc, wzc, preferred_element_type=jnp.float32) + bz
    hl = jnp.einsum("bti,ih->bth", xc, whc, preferred_element_type=jnp.float32) + bh
    log_z = -_softplus(-k)
    log_coeffs = -_softplus(k)
    log_tilde_h = _log_g(hl)
    log_h0 = _log_g(h0)[:, None, :]
    values = jnp.concatenate([log_h0, log_z + log_tilde_h], axis=1)          # (B, T+1, H)
    a_star = jnp.pad(jnp.cumsum(log_coeffs, axis=1), ((0, 0), (1, 0), (0, 0)))
    log_h = a_star + lax.associative_scan(jnp.logaddexp, values - a_star, axis=1)
    return jnp.exp(log_h)[:, 1:, :]


if __name__ == "__main__":
    key = jax.random.PRNGKey(0)

    def make_params(k, I, H):
        k1, k2, k3, k4 = jax.random.split(k, 4)
        bound = 1.0 / (I ** 0.5)
        wz = jax.random.uniform(k1, (I, H), jnp.float32, -bound, bound)
        bz = jax.random.uniform(k2, (H,), jnp.float32, -bound, bound)
        wh = jax.random.uniform(k3, (I, H), jnp.float32, -bound, bound)
        bh = jax.random.uniform(k4, (H,), jnp.float32, -bound, bound)
        return wz, bz, wh, bh

    # --- test 1: small unaligned shapes (I, H = 32 -> padded to 128), 2 T-chunks.
    B, T, I, H = 2, 32, 32, 32
    kx, kh, kp, key = jax.random.split(key, 4)
    x = jax.random.normal(kx, (B, T, I), dtype=jnp.float32)
    h0 = jax.random.normal(kh, (B, H), dtype=jnp.float32)
    wz, bz, wh, bh = make_params(kp, I, H)

    out = jax.block_until_ready(mingru_forward(x, h0, wz, bz, wh, bh, t_chunk=16))
    ref = mingru_ref(x, h0, wz, bz, wh, bh, proj_dtype=jnp.bfloat16)
    assert out.shape == (B, T, H)
    assert jnp.allclose(out, ref, atol=1e-4, rtol=1e-3), \
        float(jnp.max(jnp.abs(out - ref)))

    # --- test 2: aligned shapes, >1 batch row per block, saturated gates,
    #             multiple T chunks exercising the carried state.
    B, T, I, H = 4, 64, 128, 128
    kx, kh, kp, key = jax.random.split(key, 4)
    x = 3.0 * jax.random.normal(kx, (B, T, I), dtype=jnp.float32)
    h0 = jax.random.normal(kh, (B, H), dtype=jnp.float32)
    wz, bz, wh, bh = make_params(kp, I, H)

    out = jax.block_until_ready(mingru_forward(x, h0, wz, bz, wh, bh, t_chunk=32))
    ref = mingru_ref(x, h0, wz, bz, wh, bh, proj_dtype=jnp.bfloat16)
    assert out.shape == (B, T, H)
    assert jnp.allclose(out, ref, atol=2e-4, rtol=2e-3), \
        float(jnp.max(jnp.abs(out - ref)))

    print("KERNEL_OK")
</pallas_src>

<mosaic_0001>
module attributes {stable_mosaic.version = 11 : i64} {
  func.func @_mingru_kernel(%arg0: i32, %arg1: i32, %arg2: memref<1x16x128xf32, #tpu.memory_space<vmem>>, %arg3: memref<1x1x128xf32, #tpu.memory_space<vmem>>, %arg4: memref<128x256xbf16, #tpu.memory_space<vmem>>, %arg5: memref<1x256xf32, #tpu.memory_space<vmem>>, %arg6: memref<1x16x128xf32, #tpu.memory_space<vmem>>, %arg7: memref<1x1x128xf32, #tpu.memory_space<vmem>>, %arg8: memref<1x16x256xf32, #tpu.memory_space<vmem>>) attributes {dimension_semantics = [#tpu.dimension_semantics<parallel>, #tpu.dimension_semantics<arbitrary>], iteration_bounds = array<i64: 2, 2>, scalar_prefetch = 0 : i64, scratch_operands = 2 : i64, tpu.core_type = #tpu.core_type<tc>, window_params = [{transform_indices = @transform_0, window_bounds = array<i64: 1, 16, 128>}, {transform_indices = @transform_1, window_bounds = array<i64: 1, 1, 128>}, {pipeline_mode = #tpu.pipeline_mode<synchronous>, transform_indices = @transform_2, window_bounds = array<i64: 128, 256>}, {pipeline_mode = #tpu.pipeline_mode<synchronous>, transform_indices = @transform_3, window_bounds = array<i64: 1, 256>}, {transform_indices = @transform_4, window_bounds = array<i64: 1, 16, 128>}]} {
    %c0_i32 = arith.constant 0 : i32
    %0 = arith.cmpi eq, %arg1, %c0_i32 : i32
    %1 = arith.extui %0 : i1 to i32
    %c0_i32_0 = arith.constant 0 : i32
    %2 = arith.cmpi ne, %1, %c0_i32_0 : i32
    scf.if %2 {
      %c0_36 = arith.constant 0 : index
      %c0_37 = arith.constant 0 : index
      %c0_38 = arith.constant 0 : index
      %98 = vector.load %arg3[%c0_36, %c0_37, %c0_38] : memref<1x1x128xf32, #tpu.memory_space<vmem>>, vector<1x1x128xf32>
      %99 = math.absf %98 : vector<1x1x128xf32>
      %cst_39 = arith.constant 0.000000e+00 : f32
      %100 = vector.broadcast %cst_39 : f32 to vector<1x1x128xf32>
      %101 = arith.subf %100, %99 : vector<1x1x128xf32>
      %102 = math.exp %101 : vector<1x1x128xf32>
      %cst_40 = arith.constant 0.000000e+00 : f32
      %103 = vector.broadcast %cst_40 : f32 to vector<1x1x128xf32>
      %104 = arith.cmpf oge, %98, %103 : vector<1x1x128xf32>
      %cst_41 = arith.constant 5.000000e-01 : f32
      %105 = vector.broadcast %cst_41 : f32 to vector<1x1x128xf32>
      %106 = arith.addf %98, %105 : vector<1x1x128xf32>
      %cst_42 = arith.constant 1.000000e+00 : f32
      %107 = vector.broadcast %cst_42 : f32 to vector<1x1x128xf32>
      %108 = arith.addf %107, %102 : vector<1x1x128xf32>
      %109 = arith.divf %102, %108 : vector<1x1x128xf32>
      %110 = arith.select %104, %106, %109 : vector<1x1x128xi1>, vector<1x1x128xf32>
      %c0_43 = arith.constant 0 : index
      %c0_44 = arith.constant 0 : index
      %c0_45 = arith.constant 0 : index
      %111 = vector.load %arg7[%c0_43, %c0_44, %c0_45] : memref<1x1x128xf32, #tpu.memory_space<vmem>>, vector<1x1x128xf32>
      tpu.vector_store %arg7[%c0_43, %c0_44, %c0_45], %110 {strides = array<i32>} : memref<1x1x128xf32, #tpu.memory_space<vmem>>, vector<1x1x128xf32>,
    } else {
    }
    %c0 = arith.constant 0 : index
    %c0_1 = arith.constant 0 : index
    %c0_2 = arith.constant 0 : index
    %3 = vector.load %arg2[%c0, %c0_1, %c0_2] : memref<1x16x128xf32, #tpu.memory_space<vmem>>, vector<1x16x128xf32>
    %4 = vector.shape_cast %3 : vector<1x16x128xf32> to vector<16x128xf32>
    %5 = arith.truncf %4 : vector<16x128xf32> to vector<16x128xbf16>
    %c0_3 = arith.constant 0 : index
    %c0_4 = arith.constant 0 : index
    %6 = vector.load %arg4[%c0_3, %c0_4] : memref<128x256xbf16, #tpu.memory_space<vmem>>, vector<128x256xbf16>
    %cst = arith.constant dense<0.000000e+00> : vector<16x256xf32>
    %7 = tpu.matmul %5, %6, %cst {dimension_numbers = #tpu.dot_dimension_numbers<[1], [0], [0], [1], [0, 0, 1, 1], [], []>} : vector<16x128xbf16>, vector<128x256xbf16>, vector<16x256xf32> -> vector<16x256xf32>
    %c0_5 = arith.constant 0 : index
    %c0_6 = arith.constant 0 : index
    %8 = vector.load %arg5[%c0_5, %c0_6] : memref<1x256xf32, #tpu.memory_space<vmem>>, vector<1x256xf32>
    %9 = vector.broadcast %8 : vector<1x256xf32> to vector<16x256xf32>
    %10 = arith.addf %7, %9 : vector<16x256xf32>
    %11 = vector.shape_cast %10 : vector<16x256xf32> to vector<1x16x256xf32>
    %c0_7 = arith.constant 0 : index
    %c0_8 = arith.constant 0 : index
    %c0_9 = arith.constant 0 : index
    %12 = vector.load %arg8[%c0_7, %c0_8, %c0_9] : memref<1x16x256xf32, #tpu.memory_space<vmem>>, vector<1x16x256xf32>
    tpu.vector_store %arg8[%c0_7, %c0_8, %c0_9], %11 {strides = array<i32>} : memref<1x16x256xf32, #tpu.memory_space<vmem>>, vector<1x16x256xf32>,
    %c0_i32_10 = arith.constant 0 : i32
    %13 = arith.index_cast %c0_i32_10 : i32 to index
    %c0_11 = arith.constant 0 : index
    %c0_12 = arith.constant 0 : index
    %14 = vector.load %arg8[%13, %c0_11, %c0_12] : memref<1x16x256xf32, #tpu.memory_space<vmem>>, vector<1x16x256xf32>
    %15 = vector.shape_cast %14 : vector<1x16x256xf32> to vector<16x256xf32>
    %16 = vector.extract_strided_slice %15 {offsets = [0, 0], sizes = [16, 128], strides = [1, 1]} : vector<16x256xf32> to vector<16x128xf32>
    %17 = vector.extract_strided_slice %15 {offsets = [0, 128], sizes = [16, 128], strides = [1, 1]} : vector<16x256xf32> to vector<16x128xf32>
    %18 = math.absf %16 : vector<16x128xf32>
    %cst_13 = arith.constant 0.000000e+00 : f32
    %19 = vector.broadcast %cst_13 : f32 to vector<16x128xf32>
    %20 = arith.subf %19, %18 : vector<16x128xf32>
    %21 = math.exp %20 : vector<16x128xf32>
    %cst_14 = arith.constant 1.000000e+00 : f32
    %22 = vector.broadcast %cst_14 : f32 to vector<16x128xf32>
    %23 = arith.addf %22, %21 : vector<16x128xf32>
    %cst_15 = arith.constant 1.000000e+00 : f32
    %24 = vector.broadcast %cst_15 : f32 to vector<16x128xf32>
    %25 = arith.divf %24, %23 : vector<16x128xf32>
    %cst_16 = arith.constant 0.000000e+00 : f32
    %26 = vector.broadcast %cst_16 : f32 to vector<16x128xf32>
    %27 = arith.cmpf oge, %16, %26 : vector<16x128xf32>
    %28 = arith.mulf %21, %25 : vector<16x128xf32>
    %29 = arith.select %27, %25, %28 : vector<16x128xi1>, vector<16x128xf32>
    %cst_17 = arith.constant 0.000000e+00 : f32
    %30 = vector.broadcast %cst_17 : f32 to vector<16x128xf32>
    %31 = arith.cmpf oge, %16, %30 : vector<16x128xf32>
    %32 = arith.mulf %21, %25 : vector<16x128xf32>
    %33 = arith.select %31, %32, %25 : vector<16x128xi1>, vector<16x128xf32>
    %34 = math.absf %17 : vector<16x128xf32>
    %cst_18 = arith.constant 0.000000e+00 : f32
    %35 = vector.broadcast %cst_18 : f32 to vector<16x128xf32>
    %36 = arith.subf %35, %34 : vector<16x128xf32>
    %37 = math.exp %36 : vector<16x128xf32>
    %cst_19 = arith.constant 0.000000e+00 : f32
    %38 = vector.broadcast %cst_19 : f32 to vector<16x128xf32>
    %39 = arith.cmpf oge, %17, %38 : vector<16x128xf32>
    %cst_20 = arith.constant 5.000000e-01 : f32
    %40 = vector.broadcast %cst_20 : f32 to vector<16x128xf32>
    %41 = arith.addf %17, %40 : vector<16x128xf32>
    %cst_21 = arith.constant 1.000000e+00 : f32
    %42 = vector.broadcast %cst_21 : f32 to vector<16x128xf32>
    %43 = arith.addf %42, %37 : vector<16x128xf32>
    %44 = arith.divf %37, %43 : vector<16x128xf32>
    %45 = arith.select %39, %41, %44 : vector<16x128xi1>, vector<16x128xf32>
    %46 = arith.mulf %29, %45 : vector<16x128xf32>
    %cst_22 = arith.constant 1.000000e+00 : f32
    %47 = vector.broadcast %cst_22 : f32 to vector<1x128xf32>
    %48 = vector.extract_strided_slice %33 {offsets = [0, 0], sizes = [15, 128], strides = [1, 1]} : vector<16x128xf32> to vector<15x128xf32>
    %49 = tpu.concatenate %47, %48 in 0 : vector<1x128xf32>, vector<15x128xf32> -> vector<16x128xf32>
    %cst_23 = arith.constant 0.000000e+00 : f32
    %50 = vector.broadcast %cst_23 : f32 to vector<1x128xf32>
    %51 = vector.extract_strided_slice %46 {offsets = [0, 0], sizes = [15, 128], strides = [1, 1]} : vector<16x128xf32> to vector<15x128xf32>
    %52 = tpu.concatenate %50, %51 in 0 : vector<1x128xf32>, vector<15x128xf32> -> vector<16x128xf32>
    %53 = arith.mulf %33, %52 : vector<16x128xf32>
    %54 = arith.addf %53, %46 : vector<16x128xf32>
    %55 = arith.mulf %49, %33 : vector<16x128xf32>
    %cst_24 = arith.constant 1.000000e+00 : f32
    %56 = vector.broadcast %cst_24 : f32 to vector<2x128xf32>
    %57 = vector.extract_strided_slice %55 {offsets = [0, 0], sizes = [14, 128], strides = [1, 1]} : vector<16x128xf32> to vector<14x128xf32>
    %58 = tpu.concatenate %56, %57 in 0 : vector<2x128xf32>, vector<14x128xf32> -> vector<16x128xf32>
    %cst_25 = arith.constant 0.000000e+00 : f32
    %59 = vector.broadcast %cst_25 : f32 to vector<2x128xf32>
    %60 = vector.extract_strided_slice %54 {offsets = [0, 0], sizes = [14, 128], strides = [1, 1]} : vector<16x128xf32> to vector<14x128xf32>
    %61 = tpu.concatenate %59, %60 in 0 : vector<2x128xf32>, vector<14x128xf32> -> vector<16x128xf32>
    %62 = arith.mulf %55, %61 : vector<16x128xf32>
    %63 = arith.addf %62, %54 : vector<16x128xf32>
    %64 = arith.mulf %58, %55 : vector<16x128xf32>
    %cst_26 = arith.constant 1.000000e+00 : f32
    %65 = vector.broadcast %cst_26 : f32 to vector<4x128xf32>
    %66 = vector.extract_strided_slice %64 {offsets = [0, 0], sizes = [12, 128], strides = [1, 1]} : vector<16x128xf32> to vector<12x128xf32>
    %67 = tpu.concatenate %65, %66 in 0 : vector<4x128xf32>, vector<12x128xf32> -> vector<16x128xf32>
    %cst_27 = arith.constant 0.000000e+00 : f32
    %68 = vector.broadcast %cst_27 : f32 to vector<4x128xf32>
    %69 = vector.extract_strided_slice %63 {offsets = [0, 0], sizes = [12, 128], strides = [1, 1]} : vector<16x128xf32> to vector<12x128xf32>
    %70 = tpu.concatenate %68, %69 in 0 : vector<4x128xf32>, vector<12x128xf32> -> vector<16x128xf32>
    %71 = arith.mulf %64, %70 : vector<16x128xf32>
    %72 = arith.addf %71, %63 : vector<16x128xf32>
    %73 = arith.mulf %67, %64 : vector<16x128xf32>
    %cst_28 = arith.constant 1.000000e+00 : f32
    %74 = vector.broadcast %cst_28 : f32 to vector<8x128xf32>
    %75 = vector.extract_strided_slice %73 {offsets = [0, 0], sizes = [8, 128], strides = [1, 1]} : vector<16x128xf32> to vector<8x128xf32>
    %76 = tpu.concatenate %74, %75 in 0 : vector<8x128xf32>, vector<8x128xf32> -> vector<16x128xf32>
    %cst_29 = arith.constant 0.000000e+00 : f32
    %77 = vector.broadcast %cst_29 : f32 to vector<8x128xf32>
    %78 = vector.extract_strided_slice %72 {offsets = [0, 0], sizes = [8, 128], strides = [1, 1]} : vector<16x128xf32> to vector<8x128xf32>
    %79 = tpu.concatenate %77, %78 in 0 : vector<8x128xf32>, vector<8x128xf32> -> vector<16x128xf32>
    %80 = arith.mulf %73, %79 : vector<16x128xf32>
    %81 = arith.addf %80, %72 : vector<16x128xf32>
    %82 = arith.mulf %76, %73 : vector<16x128xf32>
    %83 = arith.index_cast %c0_i32_10 : i32 to index
    %c0_30 = arith.constant 0 : index
    %c0_31 = arith.constant 0 : index
    %84 = vector.load %arg7[%83, %c0_30, %c0_31] : memref<1x1x128xf32, #tpu.memory_space<vmem>>, vector<1x1x128xf32>
    %85 = vector.shape_cast %84 : vector<1x1x128xf32> to vector<1x128xf32>
    %86 = vector.broadcast %85 : vector<1x128xf32> to vector<16x128xf32>
    %87 = arith.mulf %82, %86 : vector<16x128xf32>
    %88 = arith.addf %87, %81 : vector<16x128xf32>
    %89 = arith.index_cast %c0_i32_10 : i32 to index
    %c0_32 = arith.constant 0 : index
    %c0_33 = arith.constant 0 : index
    %90 = vector.load %arg6[%89, %c0_32, %c0_33] : memref<1x16x128xf32, #tpu.memory_space<vmem>>, vector<1x16x128xf32>
    %91 = vector.shape_cast %90 : vector<1x16x128xf32> to vector<16x128xf32>
    %92 = vector.shape_cast %88 : vector<16x128xf32> to vector<1x16x128xf32>
    tpu.vector_store %arg6[%89, %c0_32, %c0_33], %92 {strides = array<i32>} : memref<1x16x128xf32, #tpu.memory_space<vmem>>, vector<1x16x128xf32>,
    %93 = vector.extract_strided_slice %88 {offsets = [15, 0], sizes = [1, 128], strides = [1, 1]} : vector<16x128xf32> to vector<1x128xf32>
    %94 = arith.index_cast %c0_i32_10 : i32 to index
    %c0_34 = arith.constant 0 : index
    %c0_35 = arith.constant 0 : index
    %95 = vector.load %arg7[%94, %c0_34, %c0_35] : memref<1x1x128xf32, #tpu.memory_space<vmem>>, vector<1x1x128xf32>
    %96 = vector.shape_cast %95 : vector<1x1x128xf32> to vector<1x128xf32>
    %97 = vector.shape_cast %93 : vector<1x128xf32> to vector<1x1x128xf32>
    tpu.vector_store %arg7[%94, %c0_34, %c0_35], %97 {strides = array<i32>} : memref<1x1x128xf32, #tpu.memory_space<vmem>>, vector<1x1x128xf32>,
    %c1_i32 = arith.constant 1 : i32
    return
  }
  func.func @transform_0(%arg0: i32, %arg1: i32) -> (i32, i32, i32) {
    %c0_i32 = arith.constant 0 : i32
    %c0_i32_0 = arith.constant 0 : i32
    return %arg0, %arg1, %c0_i32 : i32, i32, i32
  }
  func.func @transform_1(%arg0: i32, %arg1: i32) -> (i32, i32, i32) {
    %c0_i32 = arith.constant 0 : i32
    %c0_i32_0 = arith.constant 0 : i32
    %c0_i32_1 = arith.constant 0 : i32
    return %arg0, %c0_i32, %c0_i32_0 : i32, i32, i32
  }
  func.func @transform_2(%arg0: i32, %arg1: i32) -> (i32, i32) {
    %c0_i32 = arith.constant 0 : i32
    %c0_i32_0 = arith.constant 0 : i32
    %c0_i32_1 = arith.constant 0 : i32
    return %c0_i32, %c0_i32_0 : i32, i32
  }
  func.func @transform_3(%arg0: i32, %arg1: i32) -> (i32, i32) {
    %c0_i32 = arith.constant 0 : i32
    %c0_i32_0 = arith.constant 0 : i32
    %c0_i32_1 = arith.constant 0 : i32
    return %c0_i32, %c0_i32_0 : i32, i32
  }
  func.func @transform_4(%arg0: i32, %arg1: i32) -> (i32, i32, i32) {
    %c0_i32 = arith.constant 0 : i32
    %c0_i32_0 = arith.constant 0 : i32
    return %arg0, %arg1, %c0_i32 : i32, i32, i32
  }
}

</mosaic_0001>

<bundles_post_ra>
// kernel: tpu_custom_call.1
= control target key start
LH: loop header
LB: loop body
LE: loop exit
PB: predicated region body
PF: predicated region fallthrough
CT: control target
= control target key end

     0   :  { %s1475_s0 = inlined_call_operand.hbm [shape: f32[2,32,128], index: 0, kind: input, shape index: {}]   ;;  %s1476_s1 = inlined_call_operand.hbm [shape: f32[2,1,128], index: 1, kind: input, shape index: {}]   ;;  %s1477_s2 = inlined_call_operand.hbm [shape: bf16[128,256], index: 2, kind: input, shape index: {}]   ;;  %s1478_s3 = inlined_call_operand.vmem [shape: f32[1,256], index: 3, kind: input, shape index: {}]   ;;  %s1479_s4 = inlined_call_operand.hbm [shape: f32[2,32,128], index: 4, kind: output, shape index: {}]  }
   0x1   :  { %1493 = sst [smem:[#allocation22_spill]] %s1477_s2 }
   0x2   :  { %1494 = sst [smem:[#allocation23_spill]] %s1478_s3 }
   0x3   :  { %1495 = sst [smem:[#allocation24_spill]] %s1479_s4 }
   0x4   :  { %9 = vsyncpa [#allocation5], 0 }
   0x5   :  { %11 = vsyncpa [#allocation5 + $0x1], 0 }
   0x6   :  { %12 = vsyncpa [#allocation8], 0 }
   0x7   :  { %14 = vsyncpa [#allocation8 + $0x1], 0 }
   0x8   :  { %15 = vsyncpa [#allocation6], 0 }
   0x9   :  { %17 = vsyncpa [#allocation6 + $0x1], 0  ;;  %s1181_s15 = smov 0   ;;  %s1183_s16 = smov 0  }
   0xa   :  { %s1185_s17 = smov 0   ;;  %s1187_s18 = smov 0  }
   0xb   :  { %s1189_s19 = smov 0   ;;  %s1191_s20 = smov 0  }
   0xc   :  { %s1193_s21 = smov 0   ;;  %s1195_s22 = smov 0  }
   0xd   :  { %s1197_s23 = smov 0   ;;  %s1199_s24 = smov 0  }
   0xe   :  { %s1201_s25 = smov 0  }
   0xf LB: > { %1496 = sst [smem:[#allocation15_spill]] %s1117_s18  ;;  %s1237_s26 = sadd.s32 4294967295, %s1145_s25   ;;  %s1145_s25 = sphi %s1201_s25, %s23_s25   ;;  %s1141_s24 = sphi %s1199_s24, %s1538_s24   ;;  %s1137_s23 = sphi %s1197_s23, %s1529_s23   ;;  %s1133_s22 = sphi %s1195_s22, %s1537_s22   ;;  %s1129_s21 = sphi %s1193_s21, %s1528_s21   ;;  %s1125_s20 = sphi %s1191_s20, %s1536_s20   ;;  %s1121_s19 = sphi %s1189_s19, %s1535_s19   ;;  %s1117_s18 = sphi %s1187_s18, %s1534_s18   ;;  %s1113_s17 = sphi %s1185_s17, %s1533_s17   ;;  %s1109_s16 = sphi %s1183_s16, %s1532_s16   ;;  %s1105_s15 = sphi %s1181_s15, %s1531_s15  }
  0x10   : > { %1497 = sst [smem:[#allocation16_spill]] %s1133_s22  ;;  %s731_s27 = sadd.s32 4294967294, %s1145_s25  }
  0x11   : > { %1498 = sst [smem:[#allocation17_spill]] %s1137_s23  ;;  %p57_p0 = scmp.ne.s32.totalorder %s1121_s19, %s1117_s18 }
  0x12   : > { %p1490_p1 = scmp.eq.s32.totalorder %s1237_s26, 0  ;;  %p157_p3 = scmp.eq.s32.totalorder %s731_s27, 3 }
  0x13   : > { %p732_p5 = scmp.ge.s32.totalorder %s1145_s25, 1  ;;  %p164_p7 = scmp.lt.s32.totalorder %s1145_s25, 5 }
  0x14   : > { %p1246_p4 = por %p1490_p1, %p57_p0  ;;  %p1251_p6 = por %p157_p3, %p57_p0 }
  0x15   : > { %p1256_p8 = pnand %p732_p5, %p164_p7  ;;  %s1147_s5 = smov [#allocation9]  }
  0x16   : > { %s1500_s29 = scalar_select %p1251_p6, 1, 0 }
  0x17   : > { %s176_s6 = sshll.u32 %s1147_s5, 4  ;;  %p778_p9 = pneg %p1256_p8  ;;  %s177_s6 = int_to_ptr.vmem [resolvable:$true] %s176_s6 }
  0x18   : > { %1501 = sst [smem:[#allocation18_spill]] %s1500_s29  ;;  %s946_s7 = scalar_lea.vmem %s177_s6, 2048 }
  0x19   : > { %p779_p10 = pnand %p778_p9, %p1490_p1  ;;  %p947_p12 = scmp.ne.s32.totalorder %s177_s6, %s946_s7 }
  0x1a   : > { %p954_p3 = scmp.lt.s32.totalorder %s177_s6, %s177_s6  ;;  %p955_p2 = scmp.lt.s32.totalorder %s946_s7, %s946_s7 }
  0x1b   : > { %p937_p11 = pneg %p779_p10 }
  0x1c   : > { %p956_p6 = por %p955_p2, %p954_p3 }
  0x1d   : > { %p949_p13 = pnand %p947_p12, %p937_p11 }
  0x1f   : > { %p950_p0 = pneg %p949_p13 }
  0x21   : > { %p957_p5 = pnand %p956_p6, %p950_p0 }
  0x23   : > { %960 = shalt.err (!%p957_p5)
}
  0x24   : > { %s1480_s8 = smov 128   ;;  %s1481_s9 = smov 8  }
  0x25   : > { %s1503_s2 = sld [smem:[#allocation22_spill]]  ;;  %s32_s12 = sadd.s32 1, %s1137_s23 }
  0x26   : > { %p33_p2 = scmp.ge.s32.totalorder %s32_s12, 2  ;;  %s35_s13 = sadd.s32 1, %s1141_s24 }
  0x27   : > { %s44_s14 = sadd.s32 1, %s1125_s20  ;;  %p51_p6 = scmp.ne.s32.totalorder %s1125_s20, %s1121_s19 }
  0x28   : > { %s1540_s12 = smov (%p33_p2, %s32_s12), 0  ;;  %s1542_s13 = smov (!%p33_p2, %s35_s13), %s1141_s24 }
  0x29   : > { %1504 = sst [smem:[#allocation19_spill]] %s1540_s12  ;;  %s40_s27 = ssub.s32 %s1137_s23, %s1540_s12 }
  0x2a   : > { %p1491_p7 = scmp.eq.s32.totalorder %s1145_s25, 0  ;;  %p37_p9 = scmp.ge.s32.totalorder %s1542_s13, 2 }
  0x2b   : > { %781 = dma.hbm_to_vmem [thread:$0]  (!%p779_p10), %s1503_s2, 2048, %s177_s6, [#allocation8], %s1480_s8, %s1480_s8, %s1481_s9  }
  0x2c   : > { %p1505_p11 = scmp.eq.s32.totalorder %s1237_s26, 3  ;;  %p1289_p10 = por %p1491_p7, %p51_p6 }
  0x2d   : > { %p794_p13 = scmp.lt.s32.totalorder %s1145_s25, 4  ;;  %s1544_s13 = smov (%p37_p9, %s1542_s13), 0 }
  0x2e   : > { %p1283_p12 = por %p1505_p11, %p51_p6  ;;  %1509 = sst [smem:[#allocation21_spill]] %s1544_s13 }
  0x2f   : > { %s193_s7 = sand.u32 1, %s1125_s20   ;;  %s736_s10 = sshll.u32 %s1137_s23, 1 }
  0x30   : > { %s1506_s5 = scalar_select %p1283_p12, 1, 0 }
  0x31   : > { %s1300_s11 = ssub.s32 %s1141_s24, %s1544_s13  ;;  %s735_s9 = sshll.u32 %s193_s7, 4 }
  0x32   : > { %1507 = sst [smem:[#allocation20_spill]] %s1506_s5  ;;  %s41_s8 = sor.u32 %s40_s27, %s1300_s11 }
  0x33   : > { %p42_p3 = scmp.eq.s32.totalorder %s41_s8, 0  ;;  %s737_s2 = sshll.u32 %s1141_s24, 2 }
  0x34   : > { %s203_s29 = sadd.s32 %s737_s2, %s736_s10  ;;  %s197_s18 = scalar_lea.vmem [#allocation4], %s735_s9 }
  0x35   : > { %s1306_s12 = scalar_select %p42_p3, %s1125_s20, %s44_s14  }
  0x36   : > { %s206_s4 = sshll.u32 %s197_s18, 4  ;;  %s738_s5 = sshll.u32 %s203_s29, 7  ;;  %s207_s4 = int_to_ptr.vmem [resolvable:$true] %s206_s4 }
  0x37   : > { %s205_s23 = scalar_lea.hbm %s1475_s0, %s738_s5  ;;  %p1315_p5 = pnand %p794_p13, %p1289_p10 }
  0x38   : > { %s194_s8 = scalar_lea.sflag [#allocation5], %s193_s7  ;;  %s974_s14 = scalar_lea.vmem %s207_s4, 256 }
  0x39   : > { %p963_p2 = pneg %p1315_p5  ;;  %p975_p6 = scmp.ne.s32.totalorder %s207_s4, %s974_s14 }
  0x3a   : > { %s1150_s2 = smov [#allocation4]  }
  0x3b   : > { %p977_p9 = pnand %p975_p6, %p963_p2  ;;  %s979_s18 = sshll.u32 %s1150_s2, 4  ;;  %s980_s18 = int_to_ptr.vmem [resolvable:$false] %s979_s18 }
  0x3c   : > { %s981_s29 = scalar_lea.vmem %s980_s18, 512  ;;  %p982_p3 = scmp.lt.s32.totalorder %s207_s4, %s980_s18 }
  0x3d   : > { %p978_p11 = pneg %p977_p9  ;;  %p983_p1 = scmp.lt.s32.totalorder %s981_s29, %s974_s14 }
  0x3f   : > { %p984_p7 = por %p983_p1, %p982_p3 }
  0x41   : > { %p985_p0 = pnand %p984_p7, %p978_p11 }
  0x43   : > { %988 = shalt.err (!%p985_p0)
}
  0x44   : > { %s1511_s3 = smov 8   ;;  %s1512_s22 = smov 128  }
  0x45   : > { %785 = dma.hbm_to_vmem [thread:$0]  (!%p1315_p5), %s205_s23, 256, %s207_s4, %s194_s8, %s1512_s22, %s1512_s22, %s1511_s3  }
  0x46   : > { %s70_s9 = sadd.s32 1, %s1113_s17  ;;  %p1513_p1 = scmp.eq.s32.totalorder %s1300_s11, 0 }
  0x47   : > { %p77_p7 = scmp.ne.s32.totalorder %s1113_s17, %s1109_s16  ;;  %p83_p10 = scmp.ne.s32.totalorder %s1109_s16, %s1105_s15 }
  0x48   : > { %s1330_s13 = scalar_select %p1513_p1, %s1113_s17, %s70_s9  }
  0x49   : > { %s216_s27 = sand.u32 1, %s1145_s25   ;;  %s218_s5 = sand.u32 1, %s1113_s17  }
  0x4a   : > { %p1514_p0 = scmp.eq.s32.totalorder %s1145_s25, 0  ;;  %p1515_p6 = scmp.eq.s32.totalorder %s1237_s26, 0 }
  0x4b   : > { %s739_s7 = sshll.u32 %s1141_s24, 4  ;;  %s219_s10 = scalar_lea.vmem [#allocation7], %s218_s5 }
  0x4c   : > { %p79_p2 = por %p77_p7, %p1514_p0  ;;  %p1342_p9 = por %p83_p10, %p1515_p6 }
  0x4d   : > { %s226_s14 = sshll.u32 %s219_s10, 4  ;;  %s224_s23 = scalar_lea.hbm %s1476_s1, %s739_s7  ;;  %s227_s14 = int_to_ptr.vmem [resolvable:$true] %s226_s14 }
  0x4e   : > { %p1352_p5 = pnand %p794_p13, %p79_p2  ;;  %s217_s11 = scalar_lea.sflag [#allocation8], %s216_s27 }
  0x4f   : > { %s1002_s8 = scalar_lea.vmem %s227_s14, 16  ;;  %s1151_s18 = smov [#allocation7]  }
  0x50   : > { %p991_p11 = pneg %p1352_p5  ;;  %p1003_p3 = scmp.ne.s32.totalorder %s227_s14, %s1002_s8 }
  0x51   : > { %s1007_s29 = sshll.u32 %s1151_s18, 4  ;;  %s1008_s29 = int_to_ptr.vmem [resolvable:$false] %s1007_s29 }
  0x52   : > { %p1005_p1 = pnand %p1003_p3, %p991_p11  ;;  %s1009_s3 = scalar_lea.vmem %s1008_s29, 32 }
  0x53   : > { %p1010_p10 = scmp.lt.s32.totalorder %s227_s14, %s1008_s29  ;;  %p1011_p0 = scmp.lt.s32.totalorder %s1009_s3, %s1002_s8 }
  0x54   : > { %p1006_p7 = pneg %p1005_p1 }
  0x55   : > { %p1012_p6 = por %p1011_p0, %p1010_p10 }
  0x57   : > { %p1013_p12 = pnand %p1012_p6, %p1006_p7 }
  0x59   : > { %1016 = shalt.err (!%p1013_p12)
}
  0x5a   : > { %788 = dma.hbm_to_vmem [thread:$0]  (!%p1352_p5), %s224_s23, 16, %s227_s14, %s217_s11  }
  0x5b   : > { %235 = sbr.rel (%p1256_p8) target bundleno = 465 (0x1d1), region = 36  ;;  %s1363_s22 = sand.u32 (!%p1256_p8), 1, %s1121_s19  }
  0x5c   : > { %s741_s9 = sshll.u32 (!%p1256_p8), %s1363_s22, 4  ;;  %s238_s27 = scalar_lea.sflag (!%p1256_p8), [#allocation5], %s1363_s22 }
  0x5d   : > { %s1367_s5 = scalar_lea.vmem (!%p1256_p8), [#allocation4], %s741_s9 }
  0x60   : > { %1088 = dma.done.wait (%p1246_p4), %s238_s27, 256  }
  0x61   : > { %1090 = vsyncadd (%p1246_p4), %s238_s27, 4294967040  ;;  %s246_s30 = sand.u32 1, %s1237_s26   ;;  %s248_s7 = sand.u32 1, %s1109_s16  }
  0x62   : > { %s247_s10 = scalar_lea.sflag [#allocation8], %s246_s30  ;;  %s249_s14 = scalar_lea.vmem [#allocation7], %s248_s7 }
  0x63   : > { %1092 = dma.done.wait (%p1342_p9), %s247_s10, 16  }
  0x64   : > { %1094 = vsyncadd (%p1342_p9), %s247_s10, 4294967280  ;;  %p1518_p8 = scmp.eq.s32.totalorder %s1237_s26, 0 }
  0x66   : > { %1096 = dma.done.wait (%p1518_p8), [#allocation8], 2048   ;;  %p1519_p12 = pmov %p1518_p8 }
  0x67   : > { %s1383_s28 = scalar_lea.vmem [#allocation10], %s741_s9  ;;  %p744_p4 = scmp.ne.s32.totalorder %s1129_s21, 0 }
  0x68   : > { %1098 = vsyncadd (%p1519_p12), [#allocation8], 4294965248 }
  0x69   : > { %288 = sbr.rel (%p744_p4) target bundleno = 151 (0x97), region = 52 }
  0x6e   : > { %v289_v0 = vld [vmem:[%s249_s14] sm:$0x1] }
  0x6f   : > { %v290_v1 = vand.u32 2147483647, %v289_v0  ;;  %v295_v6 = vadd.f32 0.5, %v289_v0  ;;  %vm294_vm0 = vcmp.ge.f32.partialorder %v289_v0, 0.0 }
  0x71   : > { %v291_v2 = vsub.f32 0.0, %v290_v1 }
  0x73   : > { %v292_v3 = vmul.f32 1.442695, %v291_v2 }
  0x75   : > { %891 = vpow2.f32 %v292_v3 }
  0x82   : > { %v892_v4 = vpop.eup %891 }
  0x83   : > { %v296_v5 = vadd.f32 1.0, %v892_v4 }
  0x85   : > { %893 = vrcp.f32 %v296_v5 }
  0x92   : > { %v894_v7 = vpop.eup %893 }
  0x93   : > { %v298_v8 = vmul.f32 %v894_v7, %v892_v4 }
  0x95   : > { %v299_v9 = vsel %vm294_vm0, %v295_v6, %v298_v8 }
  0x96   : > { %300 = vst [vmem:[#allocation2] sm:$0x1] %v299_v9 }
  0x97 PF: > { %v895_v10 = vld [vmem:[#allocation9 + $0x74] ss:$8 sps:$4 sm:$0xff]   ;;  %v897_v11 = vld [vmem:[#allocation9 + $0x70] ss:$8 sps:$4 sm:$0xff]   ;;  %v1152_v12 = vmov 0   ;;  %v322_v30 = vlaneseq  ;;  %s1520_s2 = sld [smem:[#allocation23_spill]] }
  0x98   : > { %444 = vmatprep.mubr.bf16.mxu0 %v1152_v12  ;;  %412 = vmatprep.subr.bf16.mxu0 %v895_v10  ;;  %v898_v13 = vld [vmem:[#allocation9 + $0x64] ss:$8 sps:$4 sm:$0xff]   ;;  %v900_v14 = vld [vmem:[#allocation9 + $0x60] ss:$8 sps:$4 sm:$0xff]   ;;  %v901_v15 = vld [vmem:[#allocation9 + $0x54] ss:$8 sps:$4 sm:$0xff]  }
  0x99   : > { %413 = vmatpush1.bf16.msra.mxu0 %v897_v11  ;;  %v903_v16 = vld [vmem:[#allocation9 + $0x50] ss:$8 sps:$4 sm:$0xff]   ;;  %v904_v17 = vld [vmem:[#allocation9 + $0x44] ss:$8 sps:$4 sm:$0xff]   ;;  %v906_v18 = vld [vmem:[#allocation9 + $0x40] ss:$8 sps:$4 sm:$0xff]  }
  0x9a   : > { %414 = vmatprep.subr.bf16.mxu0 %v898_v13  ;;  %v907_v19 = vld [vmem:[#allocation9 + $0x34] ss:$8 sps:$4 sm:$0xff]   ;;  %v909_v20 = vld [vmem:[#allocation9 + $0x30] ss:$8 sps:$4 sm:$0xff]   ;;  %v910_v21 = vld [vmem:[#allocation9 + $0x24] ss:$8 sps:$4 sm:$0xff]  }
  0x9b   : > { %v912_v22 = vld [vmem:[#allocation9 + $0x20] ss:$8 sps:$4 sm:$0xff]   ;;  %v913_v23 = vld [vmem:[#allocation9 + $0x14] ss:$8 sps:$4 sm:$0xff]   ;;  %v915_v24 = vld [vmem:[#allocation9 + $0x10] ss:$8 sps:$4 sm:$0xff]  }
  0x9c   : > { %v916_v25 = vld [vmem:[#allocation9 + $0x4] ss:$8 sps:$4 sm:$0xff]   ;;  %v918_v26 = vld [vmem:[#allocation9] ss:$8 sps:$4 sm:$0xff]   ;;  %v323_v31 = vshrl.u32 %v322_v30, 7  ;;  %vm509_vm2 = vcmask 1040384  }
  0x9d   : > { %415 = vmatpush1.bf16.msra.mxu0 %v900_v14  ;;  %v301_v27 = vld [vmem:[%s1367_s5] sm:$0xff]  ;;  %v302_v28 = vld [vmem:[%s1367_s5 + $0x8] sm:$0xff]  ;;  %vm532_vm5 = vcmask 1041408   ;;  %vm555_vm7 = vcmask 1043456   ;;  %s1521_s4 = sld [smem:[#allocation16_spill]]  ;;  %s763_s23 = sshll.u32 %s1129_s21, 1 }
  0x9e   : > { %416 = vmatprep.subr.bf16.mxu0 %v901_v15  ;;  %v303_v29 = vpack.c.bf16 %v302_v28, %v301_v27  ;;  %v324_v32 = vsub.s32 0, %v323_v31  ;;  %v320_v33 = vld [vmem:[%s1520_s2] sm:$0x3]  ;;  %v328_v34 = vsub.s32 1, %v323_v31  ;;  %s1522_s8 = sld [smem:[#allocation20_spill]]  ;;  %s611_s18 = sshll.u32 %s1383_s28, 4  ;;  %s1412_s18 = int_to_ptr.vmem [resolvable:$true] %s611_s18 }
  0x9f   : > { %s1523_s9 = sld [smem:[#allocation24_spill]]  ;;  %s596_s5 = scalar_lea.sflag [#allocation6], %s1363_s22 }
  0xa0   : > { %v325_v35 = vrot.slane %v320_v33, %v324_v32  ;;  %v329_v36 = vrot.slane %v320_v33, %v328_v34  ;;  %s1017_s30 = scalar_lea.vmem %s1412_s18, 256  ;;  %s1153_s7 = smov [#allocation10]  }
  0xa1   : > { %417 = vmatpush1.bf16.msra.mxu0 %v903_v16  ;;  %p1018_p13 = scmp.ne.s32.totalorder %s1412_s18, %s1017_s30  ;;  %s1021_s10 = sshll.u32 %s1153_s7, 4  ;;  %s1022_s10 = int_to_ptr.vmem [resolvable:$false] %s1021_s10 }
  0xa2   : > { %418 = vmatprep.subr.bf16.mxu0 %v904_v17  ;;  %s1023_s14 = scalar_lea.vmem %s1022_s10, 512  ;;  %p1024_p11 = scmp.lt.s32.totalorder %s1412_s18, %s1022_s10 }
  0xa3   : > { %s764_s15 = sshll.u32 %s1521_s4, 2  ;;  %p1025_p3 = scmp.lt.s32.totalorder %s1023_s14, %s1017_s30 }
  0xa4   : > { %s608_s11 = sadd.s32 %s764_s15, %s763_s23  ;;  %p1524_p2 = scmp.ne.s32.totalorder %s1522_s8, 0 }
  0xa5   : > { %419 = vmatpush1.bf16.msra.mxu0 %v906_v18  ;;  %s765_s21 = sshll.u32 %s608_s11, 7  ;;  %p1026_p1 = por %p1025_p3, %p1024_p11 }
  0xa6   : > { %420 = vmatprep.subr.bf16.mxu0 %v907_v19  ;;  %s1410_s27 = scalar_lea.hbm %s1523_s9, %s765_s21  ;;  %p1019_p9 = pnand %p1018_p13, %p1524_p2 }
  0xa8   : > { %p1020_p5 = pneg %p1019_p9 }
  0xa9   : > { %421 = vmatpush1.bf16.msra.mxu0 %v909_v20 }
  0xaa   : > { %422 = vmatprep.subr.bf16.mxu0 %v910_v21  ;;  %p1027_p7 = pnand %p1026_p1, %p1020_p5 }
  0xad   : > { %423 = vmatpush1.bf16.msra.mxu0 %v912_v22 }
  0xae   : > { %424 = vmatprep.subr.bf16.mxu0 %v913_v23 }
  0xb1   : > { %425 = vmatpush1.bf16.msra.mxu0 %v915_v24 }
  0xb2   : > { %426 = vmatprep.subr.bf16.mxu0 %v916_v25 }
  0xb5   : > { %427 = vmatpush1.bf16.msra.mxu0 %v918_v26 }
  0xb8   : > { %445 = vmatmul.mubr.bf16.vlgmr.msra.gmra.mxu0 %v303_v29 }
 0x178   : > { %v446_v37 = vpop.f32.mrf.mxu0 }
 0x179   : > { %v447_v38 = vadd.f32 %v446_v37, %v325_v35 }
 0x17a   : > { %v448_v39 = vpop.f32.mrf.mxu0 }
 0x17b   : > { %v463_v40 = vand.u32 2147483647, %v447_v38  ;;  %v449_v41 = vadd.f32 %v448_v39, %v329_v36  ;;  %vm477_vm1 = vcmp.ge.f32.partialorder %v447_v38, 0.0 }
 0x17c   : > { %v450_v42 = vpop.f32.mrf.mxu0 }
 0x17d   : > { %v465_v43 = vsub.f32 0.0, %v463_v40  ;;  %v485_v44 = vand.u32 2147483647, %v449_v41  ;;  %v451_v45 = vadd.f32 %v450_v42, %v325_v35  ;;  %v495_v5 = vadd.f32 0.5, %v449_v41 }
 0x17e   : > { %v452_v46 = vpop.f32.mrf.mxu0  ;;  %vm493_vm3 = vcmp.ge.f32.partialorder %v449_v41, 0.0 }
 0x17f   : > { %v467_v47 = vmul.f32 1.442695, %v465_v43  ;;  %v487_v48 = vsub.f32 0.0, %v485_v44  ;;  %v453_v49 = vadd.f32 %v452_v46, %v329_v36  ;;  %v464_v50 = vand.u32 2147483647, %v451_v45 }
 0x180   : > { %vm478_vm4 = vcmp.ge.f32.partialorder %v451_v45, 0.0 }
 0x181   : > { %919 = vpow2.f32 %v467_v47  ;;  %v489_v51 = vmul.f32 1.442695, %v487_v48  ;;  %v486_v52 = vand.u32 2147483647, %v453_v49  ;;  %v466_v53 = vsub.f32 0.0, %v464_v50 }
 0x182   : > { %v496_v16 = vadd.f32 0.5, %v453_v49  ;;  %vm494_vm6 = vcmp.ge.f32.partialorder %v453_v49, 0.0 }
 0x183   : > { %921 = vpow2.f32 %v489_v51  ;;  %v488_v54 = vsub.f32 0.0, %v486_v52  ;;  %v469_v55 = vmul.f32 1.442695, %v466_v53 }
 0x185   : > { %v491_v56 = vmul.f32 1.442695, %v488_v54  ;;  %923 = vpow2.f32 %v469_v55 }
 0x187   : > { %925 = vpow2.f32 %v491_v56 }
 0x18e   : > { %v920_v57 = vpop.eup %919 }
 0x18f   : > { %v471_v58 = vadd.f32 1.0, %v920_v57 }
 0x190   : > { %v922_v59 = vpop.eup %921 }
 0x191   : > { %927 = vrcp.f32 %v471_v58  ;;  %v497_v60 = vadd.f32 1.0, %v922_v59 }
 0x192   : > { %v924_v61 = vpop.eup %923 }
 0x193   : > { %929 = vrcp.f32 %v497_v60  ;;  %v472_v63 = vadd.f32 1.0, %v924_v61 }
 0x194   : > { %v926_v62 = vpop.eup %925 }
 0x195   : > { %v498_v0 = vadd.f32 1.0, %v926_v62  ;;  %931 = vrcp.f32 %v472_v63 }
 0x197   : > { %933 = vrcp.f32 %v498_v0 }
 0x19e   : > { %v928_v1 = vpop.eup %927 }
 0x19f   : > { %v479_v2 = vmul.f32 %v928_v1, %v920_v57  ;;  %v761_v57 = vld [vmem:[#allocation2] ss:$0 sm:$0xff] }
 0x1a0   : > { %v930_v3 = vpop.eup %929 }
 0x1a1   : > { %v483_v4 = vsel %vm477_vm1, %v479_v2, %v928_v1  ;;  %v500_v6 = vmul.f32 %v930_v3, %v922_v59  ;;  %v481_v9 = vsel %vm477_vm1, %v928_v1, %v479_v2 }
 0x1a2   : > { %v510_v7 = vrot.slane %v483_v4, 7  ;;  %v932_v8 = vpop.eup %931 }
 0x1a3   : > { %v503_v10 = vsel %vm493_vm3, %v495_v5, %v500_v6  ;;  %v480_v14 = vmul.f32 %v932_v8, %v924_v61 }
 0x1a4   : > { %v934_v11 = vpop.eup %933  ;;  %v515_v12 = vsel %vm509_vm2, 1.0, %v510_v7  ;;  %v505_v13 = vmul.f32 %v503_v10, %v481_v9 }
 0x1a5   : > { %v528_v15 = vmul.f32 %v515_v12, %v483_v4  ;;  %v502_v17 = vmul.f32 %v934_v11, %v926_v62  ;;  %v484_v19 = vsel %vm478_vm4, %v480_v14, %v932_v8  ;;  %v482_v21 = vsel %vm478_vm4, %v932_v8, %v480_v14 }
 0x1a6   : > { %v518_v18 = vrot.slane %v505_v13, 7  ;;  %v511_v22 = vrot.slane %v484_v19, 7 }
 0x1a7   : > { %v533_v20 = vrot.slane %v528_v15, 6  ;;  %v504_v23 = vsel %vm494_vm6, %v496_v16, %v502_v17 }
 0x1a8   : > { %v523_v24 = vsel %vm509_vm2, 0.0, %v518_v18  ;;  %v506_v25 = vmul.f32 %v504_v23, %v482_v21  ;;  %v512_v28 = vsel %vm509_vm2, %v510_v7, %v511_v22 }
 0x1a9   : > { %v538_v26 = vsel %vm532_vm5, 1.0, %v533_v20  ;;  %v524_v27 = vmul.f32 %v523_v24, %v483_v4  ;;  %v529_v30 = vmul.f32 %v512_v28, %v484_v19 }
 0x1aa   : > { %v551_v29 = vmul.f32 %v538_v26, %v528_v15  ;;  %v519_v31 = vrot.slane %v506_v25, 7 }
 0x1ab   : > { %v526_v32 = vadd.f32 %v524_v27, %v505_v13  ;;  %v534_v33 = vrot.slane %v529_v30, 6 }
 0x1ac   : > { %v520_v34 = vsel %vm509_vm2, %v518_v18, %v519_v31  ;;  %v556_v37 = vrot.slane %v551_v29, 4 }
 0x1ad   : > { %v541_v35 = vrot.slane %v526_v32, 6  ;;  %v525_v36 = vmul.f32 %v520_v34, %v484_v19  ;;  %v535_v38 = vsel %vm532_vm5, %v533_v20, %v534_v33 }
 0x1ae   : > { %v552_v40 = vmul.f32 %v535_v38, %v529_v30  ;;  %v561_v45 = vsel %vm555_vm7, 1.0, %v556_v37 }
 0x1af   : > { %v546_v39 = vsel %vm532_vm5, 0.0, %v541_v35  ;;  %v527_v41 = vadd.f32 %v525_v36, %v506_v25  ;;  %v574_v51 = vmul.f32 %v561_v45, %v551_v29 }
 0x1b0   : > { %v547_v42 = vmul.f32 %v546_v39, %v528_v15  ;;  %v557_v43 = vrot.slane %v552_v40, 4 }
 0x1b1   : > { %v542_v44 = vrot.slane %v527_v41, 6  ;;  %v576_v59 = vmul.f32 0.0, %v574_v51  ;;  %v588_v0 = vmul.f32 %v761_v57, %v574_v51 }
 0x1b2   : > { %v549_v46 = vadd.f32 %v547_v42, %v526_v32  ;;  %v558_v49 = vsel %vm555_vm7, %v556_v37, %v557_v43 }
 0x1b3   : > { %v543_v47 = vsel %vm532_vm5, %v541_v35, %v542_v44  ;;  %v575_v55 = vmul.f32 %v558_v49, %v552_v40 }
 0x1b4   : > { %v564_v48 = vrot.slane %v549_v46, 4  ;;  %v548_v50 = vmul.f32 %v543_v47, %v529_v30 }
 0x1b5   : > { %v580_v63 = vmul.f32 %v575_v55, %v574_v51 }
 0x1b6   : > { %v569_v52 = vsel %vm555_vm7, 0.0, %v564_v48  ;;  %v550_v53 = vadd.f32 %v548_v50, %v527_v41 }
 0x1b7   : > { %v570_v54 = vmul.f32 %v569_v52, %v551_v29  ;;  %v589_v5 = vmul.f32 %v761_v57, %v580_v63 }
 0x1b8   : > { %v565_v56 = vrot.slane %v550_v53, 4 }
 0x1b9   : > { %v572_v58 = vadd.f32 %v570_v54, %v549_v46 }
 0x1ba   : > { %v566_v60 = vsel %vm555_vm7, %v564_v48, %v565_v56 }
 0x1bb   : > { %v571_v61 = vmul.f32 %v566_v60, %v552_v40  ;;  %v578_v62 = vadd.f32 %v576_v59, %v572_v58  ;;  %v577_v2 = vmul.f32 %v575_v55, %v572_v58 }
 0x1bd   : > { %v573_v1 = vadd.f32 %v571_v61, %v550_v53  ;;  %v590_v3 = vadd.f32 %v588_v0, %v578_v62 }
 0x1bf   : > { %v579_v4 = vadd.f32 %v577_v2, %v573_v1  ;;  %592 = vst [vmem:[%s1383_s28] sm:$0xff] %v590_v3 }
 0x1c1   : > { %v591_v6 = vadd.f32 %v589_v5, %v579_v4 }
 0x1c3   : > { %593 = vst [vmem:[%s1383_s28 + $0x8] sm:$0xff] %v591_v6  ;;  %594 = vst [vmem:[#allocation2 - $0x7] sm:$0x80] %v591_v6 }
 0x1c4   : > { %1030 = shalt.err (!%p1027_p7)
}
 0x1c5   : > { %s1031_s28 = scalar_lea.hbm %s1410_s27, 256  ;;  %s1035_s2 = scalar_lea.hbm %s1523_s9, 1024 }
 0x1c6   : > { %p1032_p10 = scmp.ne.s32.totalorder %s1410_s27, %s1031_s28  ;;  %p1036_p8 = scmp.lt.s32.totalorder %s1410_s27, %s1523_s9 }
 0x1c7   : > { %p1037_p12 = scmp.lt.s32.totalorder %s1035_s2, %s1031_s28 }
 0x1c8   : > { %p1033_p0 = pnand %p1032_p10, %p1524_p2 }
 0x1c9   : > { %p1038_p4 = por %p1037_p12, %p1036_p8 }
 0x1ca   : > { %p1034_p6 = pneg %p1033_p0 }
 0x1cc   : > { %p1039_p13 = pnand %p1038_p4, %p1034_p6 }
 0x1ce   : > { %1042 = shalt.err (!%p1039_p13)
}
 0x1cf   : > { %s1154_s15 = smov 128   ;;  %s1155_s11 = smov 8  }
 0x1d0   : > { %776 = dma.vmem_to_hbm [thread:$0]  (%p1524_p2), %s1412_s18, 256, %s1410_s27, %s596_s5, %s1154_s15, %s1154_s15, %s1155_s11  }
 0x1d1 PF: > { %s1525_s21 = sld [smem:[#allocation15_spill]]  ;;  %p796_p9 = scmp.ge.s32.totalorder %s1145_s25, 2 }
 0x1d2   : > { %s1526_s29 = sld [smem:[#allocation18_spill]] }
 0x1d7   : > { %s626_s3 = sand.u32 1, %s1525_s21  }
 0x1d8   : > { %p1527_p5 = scmp.ne.s32.totalorder %s1526_s29, 0  ;;  %s627_s30 = scalar_lea.sflag [#allocation6], %s626_s3 }
 0x1da   : > { %p790_p11 = pnand %p796_p9, %p1527_p5 }
 0x1dc   : > { %p791_p3 = pneg %p790_p11 }
 0x1de   : > { %1100 = dma.done.wait (%p791_p3), %s627_s30, 256  }
 0x1df   : > { %1102 = vsyncadd (%p791_p3), %s627_s30, 4294967040  ;;  %s23_s25 = sadd.s32 1, %s1145_s25   ;;  %s1528_s21 = sld [smem:[#allocation17_spill]] }
 0x1e0   : > { %p20_p1 = scmp.ge.s32.totalorder %s23_s25, 6   ;;  %s1529_s23 = sld [smem:[#allocation19_spill]] }
 0x1e1   : > { %s1530_s8 = sld [smem:[#allocation21_spill]]  ;;  %s1531_s15 = smov %s1109_s16 }
 0x1e2   : > { %s1532_s16 = smov %s1113_s17  ;;  %s1533_s17 = smov %s1330_s13 }
 0x1e3   : > { %s1534_s18 = smov %s1121_s19  ;;  %s1535_s19 = smov %s1125_s20 }
 0x1e4   : > { %s1536_s20 = smov %s1306_s12  ;;  %s1537_s22 = smov %s1141_s24 }
 0x1e5   :  { %22 = sbr.rel (!%p20_p1) target bundleno = 15 (0xf), region = 102 }
 0x1e7   : > { %s1538_s24 = smov %s1530_s8 }
 0x1ea   :  { %632 = vsyncpa [#allocation5], 1 }
 0x1eb   :  { %634 = vsyncpa [#allocation5 + $0x1], 1 }
 0x1ec   :  { %635 = vsyncpa [#allocation8], 1 }
 0x1ed   :  { %637 = vsyncpa [#allocation8 + $0x1], 1 }
 0x1ee   :  { %638 = vsyncpa [#allocation6], 1 }
 0x1ef   :  { %640 = vsyncpa [#allocation6 + $0x1], 1 }

</bundles_post_ra>
